<compile_context>
chip_gen: v6e
topology: v6e:2x2x1
jax: 0.10.0
libtpu: 0.0.40
codegen_flags: <defaults>
</compile_context>

<pallas_src>
import jax
import jax.numpy as jnp
from jax.experimental import pallas as pl
from jax.experimental.pallas import tpu as pltpu

LANE = 128


def _round_up(x, m=LANE):
    return ((x + m - 1) // m) * m


def _pad_to(x, rows, cols):
    r, c = x.shape
    return jnp.pad(x, ((0, rows - r), (0, cols - c)))


def fused_gcn_kernel(adj_ref, h_ref, w1_ref, b1_ref, w2_ref, b2_ref, o_ref):
    # ---- Layer 1: aggregate first (in_feats << hidden) ----
    agg1 = jnp.dot(adj_ref[...], h_ref[...], preferred_element_type=jnp.float32)
    h1 = jnp.dot(agg1, w1_ref[...], preferred_element_type=jnp.float32) + b1_ref[...]
    h1 = jnp.maximum(h1, 0.0)
    # ---- Layer 2: project first (out_feats << hidden), then aggregate ----
    # adj @ (h1 @ W2) + b2  ==  (adj @ h1) @ W2 + b2   (associativity)
    proj2 = jnp.dot(h1, w2_ref[...], preferred_element_type=jnp.float32)
    z2 = jnp.dot(adj_ref[...], proj2, preferred_element_type=jnp.float32) + b2_ref[...]
    o_ref[...] = z2.astype(o_ref.dtype)


def net_forward(adj, features, params):
    """Full Net.forward: relu(GCN1) -> GCN2, as a single fused Pallas call."""
    (w1, b1), (w2, b2) = params
    n, in_feats = features.shape
    hidden = w1.shape[1]
    out_feats = w2.shape[1]

    # Lane-dense padded sizes (multiples of 128).
    n_p = _round_up(n)
    f_p = _round_up(in_feats)
    h_p = _round_up(hidden)
    o_p = _round_up(out_feats)

    adj_pad = _pad_to(adj, n_p, n_p)
    feat_pad = _pad_to(features, n_p, f_p)
    w1_pad = _pad_to(w1, f_p, h_p)
    b1_pad = _pad_to(b1, 1, h_p)
    w2_pad = _pad_to(w2, h_p, o_p)
    b2_pad = _pad_to(b2, 1, o_p)

    flops = 2 * (n_p * n_p * f_p      # adj @ h
                 + n_p * f_p * h_p    # agg1 @ W1
                 + n_p * h_p * o_p    # h1 @ W2
                 + n_p * n_p * o_p)   # adj @ proj2
    bytes_accessed = 4 * (adj_pad.size + feat_pad.size + w1_pad.size
                          + b1_pad.size + w2_pad.size + b2_pad.size
                          + n_p * o_p)

    vmem = pl.BlockSpec(memory_space=pltpu.MemorySpace.VMEM)
    out_pad = pl.pallas_call(
        fused_gcn_kernel,
        out_shape=jax.ShapeDtypeStruct((n_p, o_p), jnp.float32),
        in_specs=[vmem] * 6,
        out_specs=vmem,
        cost_estimate=pl.CostEstimate(
            flops=flops, transcendentals=0, bytes_accessed=bytes_accessed),
    )(adj_pad, feat_pad, w1_pad, b1_pad, w2_pad, b2_pad)

    return out_pad[:n, :out_feats]


def net_forward_ref(adj, features, params):
    """Pure-JAX reference for correctness check."""
    (w1, b1), (w2, b2) = params
    x = jnp.maximum(adj @ features @ w1 + b1, 0.0)
    x = adj @ x @ w2 + b2
    return x


def init_linear_params(key, in_feats, out_feats):
    """Deterministic nn.Linear-style init: U(-1/sqrt(in), 1/sqrt(in))."""
    k_w, k_b = jax.random.split(key)
    bound = 1.0 / jnp.sqrt(jnp.float32(in_feats))
    # Stored as [in_feats, out_feats] (transpose of PyTorch's [out, in]).
    w = jax.random.uniform(k_w, (in_feats, out_feats), jnp.float32, -bound, bound)
    b = jax.random.uniform(k_b, (1, out_feats), jnp.float32, -bound, bound)
    return w, b


if __name__ == "__main__":
    key = jax.random.PRNGKey(0)
    k_feat, k_adj, k_l1, k_l2 = jax.random.split(key, 4)

    num_nodes = 8
    insz = 16
    hidden = 128
    outsz = 8

    # Node features [N, insz].
    features = jax.random.normal(k_feat, (num_nodes, insz), jnp.float32)

    # Deterministic random directed graph with self-loops, dense adjacency
    # adj[dst, src] = 1 if edge src -> dst.
    adj = (jax.random.uniform(k_adj, (num_nodes, num_nodes)) < 0.4).astype(jnp.float32)
    adj = jnp.maximum(adj, jnp.eye(num_nodes, dtype=jnp.float32))

    params = (
        init_linear_params(k_l1, insz, hidden),
        init_linear_params(k_l2, hidden, outsz),
    )

    fwd = jax.jit(net_forward)
    out = jax.block_until_ready(fwd(adj, features, params))

    ref = net_forward_ref(adj, features, params)
    assert out.shape == (num_nodes, outsz)
    assert jnp.allclose(out, ref, atol=1e-4, rtol=1e-4)

    print("KERNEL_OK")
</pallas_src>

<mosaic_0001>
module attributes {stable_mosaic.version = 11 : i64} {
  func.func @fused_gcn_kernel(%arg0: memref<128x128xf32, #tpu.memory_space<vmem>>, %arg1: memref<128x128xf32, #tpu.memory_space<vmem>>, %arg2: memref<128x128xf32, #tpu.memory_space<vmem>>, %arg3: memref<1x128xf32, #tpu.memory_space<vmem>>, %arg4: memref<128x128xf32, #tpu.memory_space<vmem>>, %arg5: memref<1x128xf32, #tpu.memory_space<vmem>>, %arg6: memref<128x128xf32, #tpu.memory_space<vmem>>) attributes {dimension_semantics = [], scalar_prefetch = 0 : i64, scratch_operands = 0 : i64, tpu.core_type = #tpu.core_type<tc>} {
    %c0 = arith.constant 0 : index
    %c0_0 = arith.constant 0 : index
    %0 = vector.load %arg0[%c0, %c0_0] : memref<128x128xf32, #tpu.memory_space<vmem>>, vector<128x128xf32>
    %c0_1 = arith.constant 0 : index
    %c0_2 = arith.constant 0 : index
    %1 = vector.load %arg1[%c0_1, %c0_2] : memref<128x128xf32, #tpu.memory_space<vmem>>, vector<128x128xf32>
    %cst = arith.constant dense<0.000000e+00> : vector<128x128xf32>
    %2 = tpu.matmul %0, %1, %cst {dimension_numbers = #tpu.dot_dimension_numbers<[1], [0], [0], [1], [0, 0, 1, 1], [], []>} : vector<128x128xf32>, vector<128x128xf32>, vector<128x128xf32> -> vector<128x128xf32>
    %c0_3 = arith.constant 0 : index
    %c0_4 = arith.constant 0 : index
    %3 = vector.load %arg2[%c0_3, %c0_4] : memref<128x128xf32, #tpu.memory_space<vmem>>, vector<128x128xf32>
    %cst_5 = arith.constant dense<0.000000e+00> : vector<128x128xf32>
    %4 = tpu.matmul %2, %3, %cst_5 {dimension_numbers = #tpu.dot_dimension_numbers<[1], [0], [0], [1], [0, 0, 1, 1], [], []>} : vector<128x128xf32>, vector<128x128xf32>, vector<128x128xf32> -> vector<128x128xf32>
    %c0_6 = arith.constant 0 : index
    %c0_7 = arith.constant 0 : index
    %5 = vector.load %arg3[%c0_6, %c0_7] : memref<1x128xf32, #tpu.memory_space<vmem>>, vector<1x128xf32>
    %6 = vector.broadcast %5 : vector<1x128xf32> to vector<128x128xf32>
    %7 = arith.addf %4, %6 : vector<128x128xf32>
    %cst_8 = arith.constant 0.000000e+00 : f32
    %8 = vector.broadcast %cst_8 : f32 to vector<128x128xf32>
    %9 = arith.maximumf %7, %8 : vector<128x128xf32>
    %c0_9 = arith.constant 0 : index
    %c0_10 = arith.constant 0 : index
    %10 = vector.load %arg4[%c0_9, %c0_10] : memref<128x128xf32, #tpu.memory_space<vmem>>, vector<128x128xf32>
    %cst_11 = arith.constant dense<0.000000e+00> : vector<128x128xf32>
    %11 = tpu.matmul %9, %10, %cst_11 {dimension_numbers = #tpu.dot_dimension_numbers<[1], [0], [0], [1], [0, 0, 1, 1], [], []>} : vector<128x128xf32>, vector<128x128xf32>, vector<128x128xf32> -> vector<128x128xf32>
    %c0_12 = arith.constant 0 : index
    %c0_13 = arith.constant 0 : index
    %12 = vector.load %arg0[%c0_12, %c0_13] : memref<128x128xf32, #tpu.memory_space<vmem>>, vector<128x128xf32>
    %cst_14 = arith.constant dense<0.000000e+00> : vector<128x128xf32>
    %13 = tpu.matmul %12, %11, %cst_14 {dimension_numbers = #tpu.dot_dimension_numbers<[1], [0], [0], [1], [0, 0, 1, 1], [], []>} : vector<128x128xf32>, vector<128x128xf32>, vector<128x128xf32> -> vector<128x128xf32>
    %c0_15 = arith.constant 0 : index
    %c0_16 = arith.constant 0 : index
    %14 = vector.load %arg5[%c0_15, %c0_16] : memref<1x128xf32, #tpu.memory_space<vmem>>, vector<1x128xf32>
    %15 = vector.broadcast %14 : vector<1x128xf32> to vector<128x128xf32>
    %16 = arith.addf %13, %15 : vector<128x128xf32>
    %c0_17 = arith.constant 0 : index
    %c0_18 = arith.constant 0 : index
    %17 = vector.load %arg6[%c0_17, %c0_18] : memref<128x128xf32, #tpu.memory_space<vmem>>, vector<128x128xf32>
    tpu.vector_store %arg6[%c0_17, %c0_18], %16 {strides = array<i32>} : memref<128x128xf32, #tpu.memory_space<vmem>>, vector<128x128xf32>,
    return
  }
}

</mosaic_0001>

<bundles_post_ra>
// kernel: net_forward.1
= control target key start
LH: loop header
LB: loop body
LE: loop exit
PB: predicated region body
PF: predicated region fallthrough
CT: control target
= control target key end

     0   :  { %s1416_s1 = inlined_call_operand.vmem [shape: f32[128,128], index: 1, kind: input, shape index: {}]   ;;  %s1417_s0 = inlined_call_operand.vmem [shape: f32[128,128], index: 0, kind: input, shape index: {}]   ;;  %s1418_s2 = inlined_call_operand.vmem [shape: f32[128,128], index: 2, kind: input, shape index: {}]   ;;  %s1419_s4 = inlined_call_operand.vmem [shape: f32[128,128], index: 4, kind: input, shape index: {}]   ;;  %s1420_s3 = inlined_call_operand.vmem [shape: f32[1,128], index: 3, kind: input, shape index: {}]   ;;  %s1421_s5 = inlined_call_operand.vmem [shape: f32[1,128], index: 5, kind: input, shape index: {}]   ;;  %s1422_s6 = inlined_call_operand.vmem [shape: f32[128,128], index: 6, kind: output, shape index: {}]  }
   0x1   :  { %v54_v0 = vld [vmem:[%s1416_s1 + $0x78] sm:$0xff]  ;;  %v53_v1 = vld [vmem:[%s1416_s1 + $0x70] sm:$0xff]  ;;  %v52_v2 = vld [vmem:[%s1416_s1 + $0x68] sm:$0xff] }
   0x2   :  { %847 = vmatprep.subr.mxu0 %v54_v0  ;;  %v51_v3 = vld [vmem:[%s1416_s1 + $0x60] sm:$0xff]  ;;  %v50_v5 = vld [vmem:[%s1416_s1 + $0x58] sm:$0xff]  ;;  %v49_v6 = vld [vmem:[%s1416_s1 + $0x50] sm:$0xff] }
   0x3   :  { %848 = vmatpush3.msra.mxu0 %v54_v0  ;;  %v1121_v4 = vld [vmem:[%s1417_s0] sm:$0xff]  ;;  %v48_v7 = vld [vmem:[%s1416_s1 + $0x48] sm:$0xff]  ;;  %v215_v8 = vld [vmem:[%s1418_s2 + $0x78] sm:$0xff] }
   0x4   :  { %849 = vmatprep.subr.mxu0 %v53_v1  ;;  %879 = vmatprep.mubr.f32.mxu0 %v1121_v4  ;;  %v214_v9 = vld [vmem:[%s1418_s2 + $0x70] sm:$0xff]  ;;  %v47_v10 = vld [vmem:[%s1416_s1 + $0x40] sm:$0xff]  ;;  %v213_v11 = vld [vmem:[%s1418_s2 + $0x68] sm:$0xff] }
   0x5   :  { %850 = vmatpush3.msra.mxu0 %v53_v1  ;;  %903 = vmatprep.subr.mxu1 %v215_v8  ;;  %v46_v12 = vld [vmem:[%s1416_s1 + $0x38] sm:$0xff]  ;;  %v212_v13 = vld [vmem:[%s1418_s2 + $0x60] sm:$0xff]  ;;  %v45_v14 = vld [vmem:[%s1416_s1 + $0x30] sm:$0xff] }
   0x6   :  { %851 = vmatprep.subr.mxu0 %v52_v2  ;;  %904 = vmatpush3.msra.mxu1 %v215_v8  ;;  %v211_v15 = vld [vmem:[%s1418_s2 + $0x58] sm:$0xff]  ;;  %v44_v16 = vld [vmem:[%s1416_s1 + $0x28] sm:$0xff]  ;;  %v210_v17 = vld [vmem:[%s1418_s2 + $0x50] sm:$0xff] }
   0x7   :  { %852 = vmatpush3.msra.mxu0 %v52_v2  ;;  %905 = vmatprep.subr.mxu1 %v214_v9  ;;  %v43_v18 = vld [vmem:[%s1416_s1 + $0x20] sm:$0xff]  ;;  %v209_v19 = vld [vmem:[%s1418_s2 + $0x48] sm:$0xff]  ;;  %v42_v20 = vld [vmem:[%s1416_s1 + $0x18] sm:$0xff] }
   0x8   :  { %853 = vmatprep.subr.mxu0 %v51_v3  ;;  %906 = vmatpush3.msra.mxu1 %v214_v9  ;;  %v208_v21 = vld [vmem:[%s1418_s2 + $0x40] sm:$0xff]  ;;  %v41_v22 = vld [vmem:[%s1416_s1 + $0x10] sm:$0xff]  ;;  %v207_v23 = vld [vmem:[%s1418_s2 + $0x38] sm:$0xff] }
   0x9   :  { %854 = vmatpush3.msra.mxu0 %v51_v3  ;;  %907 = vmatprep.subr.mxu1 %v213_v11  ;;  %v40_v24 = vld [vmem:[%s1416_s1 + $0x8] sm:$0xff]  ;;  %v206_v25 = vld [vmem:[%s1418_s2 + $0x30] sm:$0xff]  ;;  %v39_v26 = vld [vmem:[%s1416_s1] sm:$0xff] }
   0xa   :  { %855 = vmatprep.subr.mxu0 %v50_v5  ;;  %908 = vmatpush3.msra.mxu1 %v213_v11  ;;  %v205_v27 = vld [vmem:[%s1418_s2 + $0x28] sm:$0xff]  ;;  %v204_v29 = vld [vmem:[%s1418_s2 + $0x20] sm:$0xff]  ;;  %v1204_v30 = vld [vmem:[%s1417_s0 + $0x10] sm:$0xff] }
   0xb   :  { %856 = vmatpush3.msra.mxu0 %v50_v5  ;;  %909 = vmatprep.subr.mxu1 %v212_v13  ;;  %v1196_v28 = vld [vmem:[%s1417_s0 + $0x8] sm:$0xff]  ;;  %v203_v31 = vld [vmem:[%s1418_s2 + $0x18] sm:$0xff]  ;;  %v202_v33 = vld [vmem:[%s1418_s2 + $0x10] sm:$0xff] }
   0xc   :  { %857 = vmatprep.subr.mxu0 %v49_v6  ;;  %910 = vmatpush3.msra.mxu1 %v212_v13  ;;  %v1214_v32 = vld [vmem:[%s1417_s0 + $0x18] sm:$0xff]  ;;  %v1222_v34 = vld [vmem:[%s1417_s0 + $0x20] sm:$0xff]  ;;  %v1229_v35 = vld [vmem:[%s1417_s0 + $0x28] sm:$0xff] }
   0xd   :  { %858 = vmatpush3.msra.mxu0 %v49_v6  ;;  %911 = vmatprep.subr.mxu1 %v211_v15  ;;  %v1234_v36 = vld [vmem:[%s1417_s0 + $0x30] sm:$0xff]  ;;  %v1241_v37 = vld [vmem:[%s1417_s0 + $0x38] sm:$0xff]  ;;  %v1246_v38 = vld [vmem:[%s1417_s0 + $0x40] sm:$0xff] }
   0xe   :  { %859 = vmatprep.subr.mxu0 %v48_v7  ;;  %912 = vmatpush3.msra.mxu1 %v211_v15  ;;  %v1253_v39 = vld [vmem:[%s1417_s0 + $0x48] sm:$0xff]  ;;  %v1258_v40 = vld [vmem:[%s1417_s0 + $0x50] sm:$0xff]  ;;  %v1265_v41 = vld [vmem:[%s1417_s0 + $0x58] sm:$0xff] }
   0xf   :  { %860 = vmatpush3.msra.mxu0 %v48_v7  ;;  %913 = vmatprep.subr.mxu1 %v210_v17  ;;  %v1270_v42 = vld [vmem:[%s1417_s0 + $0x60] sm:$0xff]  ;;  %v1277_v43 = vld [vmem:[%s1417_s0 + $0x68] sm:$0xff]  ;;  %v1282_v44 = vld [vmem:[%s1417_s0 + $0x70] sm:$0xff] }
  0x10   :  { %861 = vmatprep.subr.mxu0 %v47_v10  ;;  %914 = vmatpush3.msra.mxu1 %v210_v17  ;;  %v1289_v45 = vld [vmem:[%s1417_s0 + $0x78] sm:$0xff]  ;;  %v201_v46 = vld [vmem:[%s1418_s2 + $0x8] sm:$0xff]  ;;  %v200_v47 = vld [vmem:[%s1418_s2] sm:$0xff] }
  0x11   :  { %862 = vmatpush3.msra.mxu0 %v47_v10  ;;  %915 = vmatprep.subr.mxu1 %v209_v19  ;;  %v399_v48 = vld [vmem:[%s1419_s4 + $0x78] sm:$0xff]  ;;  %v398_v49 = vld [vmem:[%s1419_s4 + $0x70] sm:$0xff]  ;;  %v397_v50 = vld [vmem:[%s1419_s4 + $0x68] sm:$0xff] }
  0x12   :  { %863 = vmatprep.subr.mxu0 %v46_v12  ;;  %916 = vmatpush3.msra.mxu1 %v209_v19  ;;  %v396_v51 = vld [vmem:[%s1419_s4 + $0x60] sm:$0xff]  ;;  %v395_v52 = vld [vmem:[%s1419_s4 + $0x58] sm:$0xff]  ;;  %v394_v53 = vld [vmem:[%s1419_s4 + $0x50] sm:$0xff] }
  0x13   :  { %864 = vmatpush3.msra.mxu0 %v46_v12  ;;  %917 = vmatprep.subr.mxu1 %v208_v21  ;;  %v393_v54 = vld [vmem:[%s1419_s4 + $0x48] sm:$0xff]  ;;  %v392_v55 = vld [vmem:[%s1419_s4 + $0x40] sm:$0xff]  ;;  %v391_v56 = vld [vmem:[%s1419_s4 + $0x38] sm:$0xff] }
  0x14   :  { %865 = vmatprep.subr.mxu0 %v45_v14  ;;  %918 = vmatpush3.msra.mxu1 %v208_v21  ;;  %v390_v57 = vld [vmem:[%s1419_s4 + $0x30] sm:$0xff]  ;;  %v389_v58 = vld [vmem:[%s1419_s4 + $0x28] sm:$0xff]  ;;  %v388_v59 = vld [vmem:[%s1419_s4 + $0x20] sm:$0xff] }
  0x15   :  { %866 = vmatpush3.msra.mxu0 %v45_v14  ;;  %919 = vmatprep.subr.mxu1 %v207_v23  ;;  %v387_v13 = vld [vmem:[%s1419_s4 + $0x18] sm:$0xff]  ;;  %v386_v14 = vld [vmem:[%s1419_s4 + $0x10] sm:$0xff]  ;;  %v385_v15 = vld [vmem:[%s1419_s4 + $0x8] sm:$0xff] }
  0x16   :  { %867 = vmatprep.subr.mxu0 %v44_v16  ;;  %920 = vmatpush3.msra.mxu1 %v207_v23 }
  0x17   :  { %868 = vmatpush3.msra.mxu0 %v44_v16  ;;  %921 = vmatprep.subr.mxu1 %v206_v25  ;;  %v717_v16 = vld [vmem:[%s1420_s3] ss:$0 sm:$0xff] }
  0x18   :  { %869 = vmatprep.subr.mxu0 %v43_v18  ;;  %922 = vmatpush3.msra.mxu1 %v206_v25 }
  0x19   :  { %870 = vmatpush3.msra.mxu0 %v43_v18  ;;  %923 = vmatprep.subr.mxu1 %v205_v27 }
  0x1a   :  { %871 = vmatprep.subr.mxu0 %v42_v20  ;;  %924 = vmatpush3.msra.mxu1 %v205_v27 }
  0x1b   :  { %872 = vmatpush3.msra.mxu0 %v42_v20  ;;  %925 = vmatprep.subr.mxu1 %v204_v29 }
  0x1c   :  { %873 = vmatprep.subr.mxu0 %v41_v22  ;;  %926 = vmatpush3.msra.mxu1 %v204_v29 }
  0x1d   :  { %874 = vmatpush3.msra.mxu0 %v41_v22  ;;  %927 = vmatprep.subr.mxu1 %v203_v31 }
  0x1e   :  { %875 = vmatprep.subr.mxu0 %v40_v24  ;;  %928 = vmatpush3.msra.mxu1 %v203_v31 }
  0x1f   :  { %876 = vmatpush3.msra.mxu0 %v40_v24  ;;  %929 = vmatprep.subr.mxu1 %v202_v33 }
  0x20   :  { %877 = vmatprep.subr.mxu0 %v39_v26  ;;  %930 = vmatpush3.msra.mxu1 %v202_v33 }
  0x21   :  { %878 = vmatpush3.msra.mxu0 %v39_v26  ;;  %931 = vmatprep.subr.mxu1 %v201_v46 }
  0x22   :  { %880 = vmatmul.mubr.f32.vlgmr.msra.gmra.mxu0 %v1196_v28  ;;  %932 = vmatpush3.msra.mxu1 %v201_v46 }
  0x23   :  { %882 = vmatprep.mubr.f32.mxu0 %v1204_v30  ;;  %933 = vmatprep.subr.mxu1 %v200_v47 }
  0x24   :  { %934 = vmatpush3.msra.mxu1 %v200_v47  ;;  %959 = vmatprep.subr.mxu0 %v399_v48 }
  0x25   :  { %960 = vmatpush3.msra.mxu0 %v399_v48 }
  0x26   :  { %883 = vmatmul.mubr.f32.gmra.mxu0 %v1214_v32  ;;  %961 = vmatprep.subr.mxu0 %v398_v49 }
  0x27   :  { %885 = vmatprep.mubr.f32.mxu0 %v1222_v34  ;;  %962 = vmatpush3.msra.mxu0 %v398_v49 }
  0x28   :  { %963 = vmatprep.subr.mxu0 %v397_v50 }
  0x29   :  { %964 = vmatpush3.msra.mxu0 %v397_v50 }
  0x2a   :  { %886 = vmatmul.mubr.f32.gmra.mxu0 %v1229_v35  ;;  %965 = vmatprep.subr.mxu0 %v396_v51 }
  0x2b   :  { %888 = vmatprep.mubr.f32.mxu0 %v1234_v36  ;;  %966 = vmatpush3.msra.mxu0 %v396_v51 }
  0x2c   :  { %967 = vmatprep.subr.mxu0 %v395_v52 }
  0x2d   :  { %968 = vmatpush3.msra.mxu0 %v395_v52 }
  0x2e   :  { %889 = vmatmul.mubr.f32.gmra.mxu0 %v1241_v37  ;;  %969 = vmatprep.subr.mxu0 %v394_v53 }
  0x2f   :  { %891 = vmatprep.mubr.f32.mxu0 %v1246_v38  ;;  %970 = vmatpush3.msra.mxu0 %v394_v53 }
  0x30   :  { %971 = vmatprep.subr.mxu0 %v393_v54 }
  0x31   :  { %972 = vmatpush3.msra.mxu0 %v393_v54 }
  0x32   :  { %892 = vmatmul.mubr.f32.gmra.mxu0 %v1253_v39  ;;  %973 = vmatprep.subr.mxu0 %v392_v55 }
  0x33   :  { %894 = vmatprep.mubr.f32.mxu0 %v1258_v40  ;;  %974 = vmatpush3.msra.mxu0 %v392_v55 }
  0x34   :  { %975 = vmatprep.subr.mxu0 %v391_v56 }
  0x35   :  { %976 = vmatpush3.msra.mxu0 %v391_v56 }
  0x36   :  { %895 = vmatmul.mubr.f32.gmra.mxu0 %v1265_v41  ;;  %977 = vmatprep.subr.mxu0 %v390_v57 }
  0x37   :  { %897 = vmatprep.mubr.f32.mxu0 %v1270_v42  ;;  %978 = vmatpush3.msra.mxu0 %v390_v57 }
  0x38   :  { %979 = vmatprep.subr.mxu0 %v389_v58 }
  0x39   :  { %980 = vmatpush3.msra.mxu0 %v389_v58 }
  0x3a   :  { %898 = vmatmul.mubr.f32.gmra.mxu0 %v1277_v43  ;;  %981 = vmatprep.subr.mxu0 %v388_v59 }
  0x3b   :  { %900 = vmatprep.mubr.f32.mxu0 %v1282_v44  ;;  %982 = vmatpush3.msra.mxu0 %v388_v59 }
  0x3c   :  { %983 = vmatprep.subr.mxu0 %v387_v13 }
  0x3d   :  { %984 = vmatpush3.msra.mxu0 %v387_v13 }
  0x3e   :  { %901 = vmatmul.mubr.f32.gmra.mxu0 %v1289_v45  ;;  %985 = vmatprep.subr.mxu0 %v386_v14 }
  0x3f   :  { %986 = vmatpush3.msra.mxu0 %v386_v14 }
  0x40   :  { %987 = vmatprep.subr.mxu0 %v385_v15 }
  0x41   :  { %988 = vmatpush3.msra.mxu0 %v385_v15 }
  0xe2   :  { %v881_v60 = vpop.f32.mrf.mxu0 }
  0xe4   :  { %v121_v61 = vpop.f32.mrf.mxu0 }
  0xe5   :  { %935 = vmatprep.mubr.f32.mxu1 %v121_v61 }
  0xe6   :  { %v884_v62 = vpop.f32.mrf.mxu0  ;;  %936 = vmatmul.mubr.f32.vlgmr.msra.gmra.mxu1 %v881_v60 }
  0xe8   :  { %v131_v63 = vpop.f32.mrf.mxu0 }
  0xe9   :  { %938 = vmatprep.mubr.f32.mxu1 %v131_v63 }
  0xea   :  { %v887_v0 = vpop.f32.mrf.mxu0  ;;  %939 = vmatmul.mubr.f32.gmra.mxu1 %v884_v62 }
  0xec   :  { %v141_v1 = vpop.f32.mrf.mxu0 }
  0xed   :  { %941 = vmatprep.mubr.f32.mxu1 %v141_v1 }
  0xee   :  { %v890_v2 = vpop.f32.mrf.mxu0  ;;  %942 = vmatmul.mubr.f32.gmra.mxu1 %v887_v0 }
  0xf0   :  { %v151_v3 = vpop.f32.mrf.mxu0 }
  0xf1   :  { %944 = vmatprep.mubr.f32.mxu1 %v151_v3 }
  0xf2   :  { %v893_v5 = vpop.f32.mrf.mxu0  ;;  %945 = vmatmul.mubr.f32.gmra.mxu1 %v890_v2 }
  0xf4   :  { %v161_v6 = vpop.f32.mrf.mxu0 }
  0xf5   :  { %947 = vmatprep.mubr.f32.mxu1 %v161_v6 }
  0xf6   :  { %v896_v7 = vpop.f32.mrf.mxu0  ;;  %948 = vmatmul.mubr.f32.gmra.mxu1 %v893_v5 }
  0xf8   :  { %v171_v8 = vpop.f32.mrf.mxu0 }
  0xf9   :  { %950 = vmatprep.mubr.f32.mxu1 %v171_v8 }
  0xfa   :  { %v899_v9 = vpop.f32.mrf.mxu0  ;;  %951 = vmatmul.mubr.f32.gmra.mxu1 %v896_v7 }
  0xfc   :  { %v181_v10 = vpop.f32.mrf.mxu0 }
  0xfd   :  { %953 = vmatprep.mubr.f32.mxu1 %v181_v10 }
  0xfe   :  { %v902_v11 = vpop.f32.mrf.mxu0  ;;  %954 = vmatmul.mubr.f32.gmra.mxu1 %v899_v9 }
 0x100   :  { %v191_v12 = vpop.f32.mrf.mxu0 }
 0x101   :  { %956 = vmatprep.mubr.f32.mxu1 %v191_v12 }
 0x102   :  { %957 = vmatmul.mubr.f32.gmra.mxu1 %v902_v11 }
 0x103   :  { %1047 = vmatprep.mubr.f32.mxu1 %v1121_v4  ;;  %v384_v4 = vld [vmem:[%s1419_s4] sm:$0xff] }
 0x104   :  { %989 = vmatprep.subr.mxu0 %v384_v4 }
 0x105   :  { %990 = vmatpush3.msra.mxu0 %v384_v4 }
 0x1a6   :  { %v937_v17 = vpop.f32.mrf.mxu1 }
 0x1a7   :  { %v295_v18 = vadd.f32 %v937_v17, %v717_v16 }
 0x1a8   :  { %v289_v19 = vpop.f32.mrf.mxu1 }
 0x1a9   :  { %v290_v20 = vadd.f32 %v717_v16, %v289_v19  ;;  %v369_v23 = vmax.f32 %v295_v18, 0.0 }
 0x1aa   :  { %v940_v21 = vpop.f32.mrf.mxu1 }
 0x1ab   :  { %v368_v22 = vmax.f32 %v290_v20, 0.0  ;;  %v305_v24 = vadd.f32 %v940_v21, %v717_v16 }
 0x1ac   :  { %v299_v25 = vpop.f32.mrf.mxu1 }
 0x1ad   :  { %v300_v26 = vadd.f32 %v717_v16, %v299_v25  ;;  %991 = vmatprep.mubr.f32.mxu0 %v368_v22  ;;  %v371_v31 = vmax.f32 %v305_v24, 0.0 }
 0x1ae   :  { %v943_v27 = vpop.f32.mrf.mxu1  ;;  %992 = vmatmul.mubr.f32.vlgmr.msra.gmra.mxu0 %v369_v23 }
 0x1af   :  { %v370_v29 = vmax.f32 %v300_v26, 0.0  ;;  %v315_v33 = vadd.f32 %v943_v27, %v717_v16 }
 0x1b0   :  { %v309_v46 = vpop.f32.mrf.mxu1 }
 0x1b1   :  { %v310_v47 = vadd.f32 %v717_v16, %v309_v46  ;;  %994 = vmatprep.mubr.f32.mxu0 %v370_v29  ;;  %v373_v50 = vmax.f32 %v315_v33, 0.0 }
 0x1b2   :  { %v946_v48 = vpop.f32.mrf.mxu1  ;;  %995 = vmatmul.mubr.f32.gmra.mxu0 %v371_v31 }
 0x1b3   :  { %v372_v49 = vmax.f32 %v310_v47, 0.0  ;;  %v325_v51 = vadd.f32 %v946_v48, %v717_v16 }
 0x1b4   :  { %v319_v52 = vpop.f32.mrf.mxu1 }
 0x1b5   :  { %v320_v53 = vadd.f32 %v717_v16, %v319_v52  ;;  %997 = vmatprep.mubr.f32.mxu0 %v372_v49  ;;  %v375_v56 = vmax.f32 %v325_v51, 0.0 }
 0x1b6   :  { %v949_v54 = vpop.f32.mrf.mxu1  ;;  %998 = vmatmul.mubr.f32.gmra.mxu0 %v373_v50 }
 0x1b7   :  { %v374_v55 = vmax.f32 %v320_v53, 0.0  ;;  %v335_v57 = vadd.f32 %v949_v54, %v717_v16 }
 0x1b8   :  { %v329_v58 = vpop.f32.mrf.mxu1 }
 0x1b9   :  { %v330_v59 = vadd.f32 %v717_v16, %v329_v58  ;;  %1000 = vmatprep.mubr.f32.mxu0 %v374_v55  ;;  %v377_v62 = vmax.f32 %v335_v57, 0.0 }
 0x1ba   :  { %v952_v60 = vpop.f32.mrf.mxu1  ;;  %1001 = vmatmul.mubr.f32.gmra.mxu0 %v375_v56 }
 0x1bb   :  { %v376_v61 = vmax.f32 %v330_v59, 0.0  ;;  %v345_v63 = vadd.f32 %v952_v60, %v717_v16 }
 0x1bc   :  { %v339_v0 = vpop.f32.mrf.mxu1 }
 0x1bd   :  { %v340_v1 = vadd.f32 %v717_v16, %v339_v0  ;;  %1003 = vmatprep.mubr.f32.mxu0 %v376_v61  ;;  %v379_v5 = vmax.f32 %v345_v63, 0.0 }
 0x1be   :  { %v955_v2 = vpop.f32.mrf.mxu1  ;;  %1004 = vmatmul.mubr.f32.gmra.mxu0 %v377_v62 }
 0x1bf   :  { %v378_v3 = vmax.f32 %v340_v1, 0.0  ;;  %v355_v6 = vadd.f32 %v955_v2, %v717_v16 }
 0x1c0   :  { %v349_v7 = vpop.f32.mrf.mxu1 }
 0x1c1   :  { %v350_v8 = vadd.f32 %v717_v16, %v349_v7  ;;  %1006 = vmatprep.mubr.f32.mxu0 %v378_v3  ;;  %v381_v11 = vmax.f32 %v355_v6, 0.0 }
 0x1c2   :  { %v958_v9 = vpop.f32.mrf.mxu1  ;;  %1007 = vmatmul.mubr.f32.gmra.mxu0 %v379_v5 }
 0x1c3   :  { %v380_v10 = vmax.f32 %v350_v8, 0.0  ;;  %v365_v12 = vadd.f32 %v958_v9, %v717_v16 }
 0x1c4   :  { %v359_v13 = vpop.f32.mrf.mxu1 }
 0x1c5   :  { %v360_v14 = vadd.f32 %v717_v16, %v359_v13  ;;  %1009 = vmatprep.mubr.f32.mxu0 %v380_v10  ;;  %v383_v4 = vmax.f32 %v365_v12, 0.0 }
 0x1c6   :  { %1010 = vmatmul.mubr.f32.gmra.mxu0 %v381_v11 }
 0x1c7   :  { %v382_v15 = vmax.f32 %v360_v14, 0.0 }
 0x1c9   :  { %1012 = vmatprep.mubr.f32.mxu0 %v382_v15 }
 0x1ca   :  { %1013 = vmatmul.mubr.f32.gmra.mxu0 %v383_v4 }
 0x26e   :  { %v993_v17 = vpop.f32.mrf.mxu0 }
 0x270   :  { %v466_v18 = vpop.f32.mrf.mxu0 }
 0x272   :  { %v996_v19 = vpop.f32.mrf.mxu0 }
 0x274   :  { %v476_v20 = vpop.f32.mrf.mxu0 }
 0x276   :  { %v999_v21 = vpop.f32.mrf.mxu0 }
 0x278   :  { %v486_v22 = vpop.f32.mrf.mxu0 }
 0x27a   :  { %v1002_v23 = vpop.f32.mrf.mxu0 }
 0x27c   :  { %v496_v24 = vpop.f32.mrf.mxu0 }
 0x27e   :  { %v1005_v25 = vpop.f32.mrf.mxu0 }
 0x280   :  { %v506_v26 = vpop.f32.mrf.mxu0 }
 0x282   :  { %v1008_v27 = vpop.f32.mrf.mxu0 }
 0x284   :  { %v516_v29 = vpop.f32.mrf.mxu0 }
 0x286   :  { %v1011_v31 = vpop.f32.mrf.mxu0 }
 0x288   :  { %v526_v16 = vpop.f32.mrf.mxu0 }
 0x28a   :  { %v1014_v33 = vpop.f32.mrf.mxu0 }
 0x28b   :  { %1015 = vmatprep.subr.mxu1 %v1014_v33 }
 0x28c   :  { %v536_v46 = vpop.f32.mrf.mxu0  ;;  %1016 = vmatpush3.msra.mxu1 %v1014_v33 }
 0x28d   :  { %1017 = vmatprep.subr.mxu1 %v536_v46 }
 0x28e   :  { %1018 = vmatpush3.msra.mxu1 %v536_v46 }
 0x28f   :  { %1019 = vmatprep.subr.mxu1 %v1011_v31 }
 0x290   :  { %1020 = vmatpush3.msra.mxu1 %v1011_v31 }
 0x291   :  { %1021 = vmatprep.subr.mxu1 %v526_v16 }
 0x292   :  { %1022 = vmatpush3.msra.mxu1 %v526_v16 }
 0x293   :  { %1023 = vmatprep.subr.mxu1 %v1008_v27 }
 0x294   :  { %1024 = vmatpush3.msra.mxu1 %v1008_v27 }
 0x295   :  { %1025 = vmatprep.subr.mxu1 %v516_v29 }
 0x296   :  { %1026 = vmatpush3.msra.mxu1 %v516_v29 }
 0x297   :  { %1027 = vmatprep.subr.mxu1 %v1005_v25 }
 0x298   :  { %1028 = vmatpush3.msra.mxu1 %v1005_v25 }
 0x299   :  { %1029 = vmatprep.subr.mxu1 %v506_v26 }
 0x29a   :  { %1030 = vmatpush3.msra.mxu1 %v506_v26 }
 0x29b   :  { %1031 = vmatprep.subr.mxu1 %v1002_v23 }
 0x29c   :  { %1032 = vmatpush3.msra.mxu1 %v1002_v23 }
 0x29d   :  { %1033 = vmatprep.subr.mxu1 %v496_v24 }
 0x29e   :  { %1034 = vmatpush3.msra.mxu1 %v496_v24 }
 0x29f   :  { %1035 = vmatprep.subr.mxu1 %v999_v21 }
 0x2a0   :  { %1036 = vmatpush3.msra.mxu1 %v999_v21 }
 0x2a1   :  { %1037 = vmatprep.subr.mxu1 %v486_v22 }
 0x2a2   :  { %1038 = vmatpush3.msra.mxu1 %v486_v22 }
 0x2a3   :  { %1039 = vmatprep.subr.mxu1 %v996_v19 }
 0x2a4   :  { %1040 = vmatpush3.msra.mxu1 %v996_v19 }
 0x2a5   :  { %1041 = vmatprep.subr.mxu1 %v476_v20 }
 0x2a6   :  { %1042 = vmatpush3.msra.mxu1 %v476_v20 }
 0x2a7   :  { %1043 = vmatprep.subr.mxu1 %v993_v17 }
 0x2a8   :  { %1044 = vmatpush3.msra.mxu1 %v993_v17 }
 0x2a9   :  { %1045 = vmatprep.subr.mxu1 %v466_v18 }
 0x2aa   :  { %1046 = vmatpush3.msra.mxu1 %v466_v18 }
 0x2ab   :  { %1048 = vmatmul.mubr.f32.vlgmr.msra.gmra.mxu1 %v1196_v28  ;;  %v718_v28 = vld [vmem:[%s1421_s5] ss:$0 sm:$0xff] }
 0x2ac   :  { %1050 = vmatprep.mubr.f32.mxu1 %v1204_v30 }
 0x2af   :  { %1051 = vmatmul.mubr.f32.gmra.mxu1 %v1214_v32 }
 0x2b0   :  { %1053 = vmatprep.mubr.f32.mxu1 %v1222_v34 }
 0x2b3   :  { %1054 = vmatmul.mubr.f32.gmra.mxu1 %v1229_v35 }
 0x2b4   :  { %1056 = vmatprep.mubr.f32.mxu1 %v1234_v36 }
 0x2b7   :  { %1057 = vmatmul.mubr.f32.gmra.mxu1 %v1241_v37 }
 0x2b8   :  { %1059 = vmatprep.mubr.f32.mxu1 %v1246_v38 }
 0x2bb   :  { %1060 = vmatmul.mubr.f32.gmra.mxu1 %v1253_v39 }
 0x2bc   :  { %1062 = vmatprep.mubr.f32.mxu1 %v1258_v40 }
 0x2bf   :  { %1063 = vmatmul.mubr.f32.gmra.mxu1 %v1265_v41 }
 0x2c0   :  { %1065 = vmatprep.mubr.f32.mxu1 %v1270_v42 }
 0x2c3   :  { %1066 = vmatmul.mubr.f32.gmra.mxu1 %v1277_v43 }
 0x2c4   :  { %1068 = vmatprep.mubr.f32.mxu1 %v1282_v44 }
 0x2c7   :  { %1069 = vmatmul.mubr.f32.gmra.mxu1 %v1289_v45 }
 0x36b   :  { %v1049_v30 = vpop.f32.mrf.mxu1 }
 0x36c   :  { %v624_v32 = vadd.f32 %v1049_v30, %v718_v28 }
 0x36d   :  { %v618_v34 = vpop.f32.mrf.mxu1 }
 0x36e   :  { %698 = vst [vmem:[%s1422_s6 + $0x8] sm:$0xff] %v624_v32  ;;  %v619_v35 = vadd.f32 %v718_v28, %v618_v34 }
 0x36f   :  { %v1052_v36 = vpop.f32.mrf.mxu1 }
 0x370   :  { %697 = vst [vmem:[%s1422_s6] sm:$0xff] %v619_v35  ;;  %v634_v37 = vadd.f32 %v1052_v36, %v718_v28 }
 0x371   :  { %v628_v38 = vpop.f32.mrf.mxu1 }
 0x372   :  { %700 = vst [vmem:[%s1422_s6 + $0x18] sm:$0xff] %v634_v37  ;;  %v629_v39 = vadd.f32 %v718_v28, %v628_v38 }
 0x373   :  { %v1055_v40 = vpop.f32.mrf.mxu1 }
 0x374   :  { %699 = vst [vmem:[%s1422_s6 + $0x10] sm:$0xff] %v629_v39  ;;  %v644_v41 = vadd.f32 %v1055_v40, %v718_v28 }
 0x375   :  { %v638_v42 = vpop.f32.mrf.mxu1 }
 0x376   :  { %702 = vst [vmem:[%s1422_s6 + $0x28] sm:$0xff] %v644_v41  ;;  %v639_v43 = vadd.f32 %v718_v28, %v638_v42 }
 0x377   :  { %v1058_v44 = vpop.f32.mrf.mxu1 }
 0x378   :  { %701 = vst [vmem:[%s1422_s6 + $0x20] sm:$0xff] %v639_v43  ;;  %v654_v45 = vadd.f32 %v1058_v44, %v718_v28 }
 0x379   :  { %v648_v47 = vpop.f32.mrf.mxu1 }
 0x37a   :  { %704 = vst [vmem:[%s1422_s6 + $0x38] sm:$0xff] %v654_v45  ;;  %v649_v48 = vadd.f32 %v718_v28, %v648_v47 }
 0x37b   :  { %v1061_v49 = vpop.f32.mrf.mxu1 }
 0x37c   :  { %703 = vst [vmem:[%s1422_s6 + $0x30] sm:$0xff] %v649_v48  ;;  %v664_v50 = vadd.f32 %v1061_v49, %v718_v28 }
 0x37d   :  { %v658_v51 = vpop.f32.mrf.mxu1 }
 0x37e   :  { %706 = vst [vmem:[%s1422_s6 + $0x48] sm:$0xff] %v664_v50  ;;  %v659_v52 = vadd.f32 %v718_v28, %v658_v51 }
 0x37f   :  { %v1064_v53 = vpop.f32.mrf.mxu1 }
 0x380   :  { %705 = vst [vmem:[%s1422_s6 + $0x40] sm:$0xff] %v659_v52  ;;  %v674_v54 = vadd.f32 %v1064_v53, %v718_v28 }
 0x381   :  { %v668_v55 = vpop.f32.mrf.mxu1 }
 0x382   :  { %708 = vst [vmem:[%s1422_s6 + $0x58] sm:$0xff] %v674_v54  ;;  %v669_v56 = vadd.f32 %v718_v28, %v668_v55 }
 0x383   :  { %v1067_v57 = vpop.f32.mrf.mxu1 }
 0x384   :  { %707 = vst [vmem:[%s1422_s6 + $0x50] sm:$0xff] %v669_v56  ;;  %v684_v58 = vadd.f32 %v1067_v57, %v718_v28 }
 0x385   :  { %v678_v59 = vpop.f32.mrf.mxu1 }
 0x386   :  { %710 = vst [vmem:[%s1422_s6 + $0x68] sm:$0xff] %v684_v58  ;;  %v679_v60 = vadd.f32 %v718_v28, %v678_v59 }
 0x387   :  { %v1070_v61 = vpop.f32.mrf.mxu1 }
 0x388   :  { %709 = vst [vmem:[%s1422_s6 + $0x60] sm:$0xff] %v679_v60  ;;  %v694_v62 = vadd.f32 %v1070_v61, %v718_v28 }
 0x389   :  { %v688_v63 = vpop.f32.mrf.mxu1 }
 0x38a   :  { %712 = vst [vmem:[%s1422_s6 + $0x78] sm:$0xff] %v694_v62  ;;  %v689_v0 = vadd.f32 %v718_v28, %v688_v63 }
 0x38c   :  { %711 = vst [vmem:[%s1422_s6 + $0x70] sm:$0xff] %v689_v0 }

</bundles_post_ra>
